<compile_context>
chip_gen: v5e
topology: v5e:2x2
jax: 0.10.0
libtpu: 0.0.40
codegen_flags: <defaults>
</compile_context>

<pallas_src>
import functools

import jax
import jax.numpy as jnp
from jax.experimental import pallas as pl
from jax.experimental.pallas import tpu as pltpu

HIDDEN = 128        # hidden width of both Linear layers (fixed by the PyTorch module)
LANE = 128          # TPU lane width; layer-3 output columns are padded to this
MAX_BLOCK_M = 8192  # v7x guard: keep the f32 out double-buffer <= ~8 MiB (64 MiB VMEM chip)


def _cdiv(a, b):
    return -(-a // b)


def _round_up(x, m):
    return _cdiv(x, m) * m


def _tile_batch(batch, block_m):
    """Adaptive batch tiling: bounded padding waste, >=2 grid steps for big batches."""
    num_tiles = _cdiv(batch, block_m)
    if batch > 256:
        # v7x: guarantee >= 2 grid steps so dimension_semantics=("parallel",)
        # actually feeds both TensorCores; harmless on v5e/v6e (1 TC).
        num_tiles = max(num_tiles, 2)
    bm = min(_round_up(_cdiv(batch, num_tiles), 8), MAX_BLOCK_M)
    num_tiles = _cdiv(batch, bm)
    padded = bm * num_tiles
    return bm, num_tiles, padded


# --------------------------------------------------------------------------- #
# Kernel bodies
# --------------------------------------------------------------------------- #
def _mlp_body(x, w1_ref, b1_ref, w2_ref, b2_ref, w3_ref, b3_ref):
    """3-layer MLP for one batch tile, fully VMEM-resident. Returns (bm, 128) f32."""
    state_dim = w1_ref.shape[0]

    # Layer 1: K = state_dim = 4 << MXU contraction width -> VPU broadcast-FMAs.
    # (Conditional MXU move per review only if a bundle dump shows VALU binding.)
    h1 = b1_ref[...] + x[:, 0:1] * w1_ref[0:1, :]          # (bm, 128) f32
    for k in range(1, state_dim):                           # static unroll (4 FMAs)
        h1 = h1 + x[:, k:k + 1] * w1_ref[k:k + 1, :]
    h1 = jnp.maximum(h1, 0.0)

    # Layer 2: bf16 MXU matmul, f32 accumulate, f32 bias/ReLU.
    h2 = jnp.dot(h1.astype(jnp.bfloat16), w2_ref[...],
                 preferred_element_type=jnp.float32) + b2_ref[...]
    h2 = jnp.maximum(h2, 0.0)

    # Layer 3: bf16 MXU matmul into 128 lane-dense (zero-padded) output columns.
    q = jnp.dot(h2.astype(jnp.bfloat16), w3_ref[...],
                preferred_element_type=jnp.float32) + b3_ref[...]
    return q


def dqn_qvalues_kernel(x_ref, w1_ref, b1_ref, w2_ref, b2_ref, w3_ref, b3_ref, o_ref):
    q = _mlp_body(x_ref[...], w1_ref, b1_ref, w2_ref, b2_ref, w3_ref, b3_ref)
    o_ref[...] = q.astype(o_ref.dtype)


def dqn_argmax_kernel(x_ref, w1_ref, b1_ref, w2_ref, b2_ref, w3_ref, b3_ref, o_ref,
                      *, action_dim):
    """Fused acting path: greedy action = argmax_a Q(s, a). Output 4 B/row."""
    q = _mlp_body(x_ref[...], w1_ref, b1_ref, w2_ref, b2_ref, w3_ref, b3_ref)
    lane = jax.lax.broadcasted_iota(jnp.int32, q.shape, 1)
    masked = jnp.where(lane < action_dim, q, -jnp.inf)      # ignore zero-padded lanes
    max_q = jnp.max(masked, axis=-1, keepdims=True)
    idx = jnp.min(jnp.where(masked >= max_q, lane, LANE), axis=-1, keepdims=True)
    o_ref[...] = idx.astype(jnp.int32)                      # (bm, 1)


# --------------------------------------------------------------------------- #
# pallas_call wrapper shared by both kernels
# --------------------------------------------------------------------------- #
def _run_dqn_kernel(kernel, x, params, *, out_cols, out_dtype, block_m):
    w1, b1, w2, b2, w3p, b3p = params
    batch, state_dim = x.shape

    bm, num_tiles, padded = _tile_batch(batch, block_m)
    if padded != batch:
        x = jnp.pad(x, ((0, padded - batch), (0, 0)))

    # Weights/biases: full-array blocks with constant index_map -> DMA'd once and
    # VMEM-resident across all batch tiles.
    # NOTE: pipeline_mode=pl.Buffered(1) on these grid-invariant refs would save
    # ~70 KiB of pointless double-buffering; skipped as it is not worth any
    # compile risk on this far-from-VMEM-bound kernel.
    resident = lambda a: pl.BlockSpec(a.shape, lambda i: (0,) * a.ndim)

    weight_bytes = sum(int(a.size) * a.dtype.itemsize for a in (w1, b1, w2, b2, w3p, b3p))
    out_bytes = padded * out_cols * jnp.dtype(out_dtype).itemsize
    cost = pl.CostEstimate(
        flops=2 * padded * (state_dim * HIDDEN + HIDDEN * HIDDEN + HIDDEN * LANE),
        transcendentals=0,
        bytes_accessed=padded * state_dim * 4 + out_bytes + weight_bytes,
    )

    out = pl.pallas_call(
        kernel,
        out_shape=jax.ShapeDtypeStruct((padded, out_cols), out_dtype),
        grid=(num_tiles,),
        in_specs=[
            pl.BlockSpec((bm, state_dim), lambda i: (i, 0)),   # x: tiled over batch
            resident(w1), resident(b1),
            resident(w2), resident(b2),
            resident(w3p), resident(b3p),
        ],
        out_specs=pl.BlockSpec((bm, out_cols), lambda i: (i, 0)),
        compiler_params=pltpu.CompilerParams(
            dimension_semantics=("parallel",),   # v7x: both TensorCores split the batch
        ),
        cost_estimate=cost,
    )(x, w1, b1, w2, b2, w3p, b3p)
    return out, batch


# --------------------------------------------------------------------------- #
# Public entry points
# --------------------------------------------------------------------------- #
@functools.partial(jax.jit, static_argnames=("block_m", "out_dtype"))
def dqn_qvalues_padded(x, params, *, block_m=1024, out_dtype=jnp.bfloat16):
    """Hot-path Q-values: returns the padded (padded_batch, 128) block WITHOUT the
    wrapper slice (slice / gather inside the fused consumer instead). bf16 output
    halves HBM writeback; pass out_dtype=jnp.float32 if full precision is needed."""
    out, _ = _run_dqn_kernel(dqn_qvalues_kernel, x, params,
                             out_cols=LANE, out_dtype=out_dtype, block_m=block_m)
    return out


@functools.partial(jax.jit, static_argnames=("action_dim", "block_m", "out_dtype"))
def dqn_forward(x, params, *, action_dim, block_m=1024, out_dtype=jnp.float32):
    """Module-faithful convenience path: (batch, action_dim) Q-values.
    The trailing slice re-reads the padded output from HBM; prefer
    dqn_qvalues_padded / dqn_greedy_action on performance-critical paths."""
    out, batch = _run_dqn_kernel(dqn_qvalues_kernel, x, params,
                                 out_cols=LANE, out_dtype=out_dtype, block_m=block_m)
    return out[:batch, :action_dim]


@functools.partial(jax.jit, static_argnames=("action_dim", "block_m"))
def dqn_greedy_action(x, params, *, action_dim, block_m=1024):
    """Fused acting path: argmax_a Q(s, a) computed in-kernel (int32 per row)."""
    # TODO(synk): at the call site, stack s and s' (and/or many envs) so one call
    # serves both Q(s) and Q(s') -- at batch<=8 launch overhead dominates everything.
    kernel = functools.partial(dqn_argmax_kernel, action_dim=action_dim)
    out, batch = _run_dqn_kernel(kernel, x, params,
                                 out_cols=1, out_dtype=jnp.int32, block_m=block_m)
    return out[:batch, 0]


# --------------------------------------------------------------------------- #
# Params init + reference
# --------------------------------------------------------------------------- #
def init_dqn_params(key, state_dim, action_dim, hidden=HIDDEN):
    """PyTorch nn.Linear-style init (U[-1/sqrt(fan_in), 1/sqrt(fan_in)]).
    Weights stored pre-transposed as (in_features, out_features); w2/w3 in bf16
    (MXU-native); w1 stays f32 (layer 1 runs on the VPU). Layer-3 weight/bias are
    zero-padded from action_dim to LANE output columns (lane-dense store)."""
    ks = jax.random.split(key, 6)

    def linear(kw, kb, fan_in, fan_out):
        bound = 1.0 / jnp.sqrt(jnp.float32(fan_in))
        w = jax.random.uniform(kw, (fan_in, fan_out), jnp.float32, -bound, bound)
        b = jax.random.uniform(kb, (1, fan_out), jnp.float32, -bound, bound)
        return w, b

    w1, b1 = linear(ks[0], ks[1], state_dim, hidden)
    w2, b2 = linear(ks[2], ks[3], hidden, hidden)
    w3, b3 = linear(ks[4], ks[5], hidden, action_dim)

    w3p = jnp.zeros((hidden, LANE), jnp.float32).at[:, :action_dim].set(w3)
    b3p = jnp.zeros((1, LANE), jnp.float32).at[:, :action_dim].set(b3)

    return (w1, b1,
            w2.astype(jnp.bfloat16), b2,
            w3p.astype(jnp.bfloat16), b3p)


def dqn_reference(x, params, action_dim):
    """Pure-JAX reference mirroring the kernel numerics (f32 FMA layer 1, bf16
    MXU weights with f32 accumulation for layers 2/3)."""
    w1, b1, w2, b2, w3p, b3p = params
    h1 = b1 + x[:, 0:1] * w1[0:1, :]
    for k in range(1, w1.shape[0]):
        h1 = h1 + x[:, k:k + 1] * w1[k:k + 1, :]
    h1 = jnp.maximum(h1, 0.0)
    h2 = jnp.dot(h1.astype(jnp.bfloat16), w2, preferred_element_type=jnp.float32) + b2
    h2 = jnp.maximum(h2, 0.0)
    q = jnp.dot(h2.astype(jnp.bfloat16), w3p, preferred_element_type=jnp.float32) + b3p
    return q[:, :action_dim]


# --------------------------------------------------------------------------- #
if __name__ == "__main__":
    # CartPole: state_dim=4, action_dim=2.
    state_dim, action_dim = 4, 2

    key = jax.random.PRNGKey(0)
    k_params, k_small, k_big = jax.random.split(key, 3)
    params = init_dqn_params(k_params, state_dim, action_dim)

    # Small "acting" batch (single grid step) and a replay-buffer-sized batch
    # (>= 2 batch tiles -> pipelined grid / both TensorCores on v7x).
    for k, batch in ((k_small, 8), (k_big, 512)):
        x = jax.random.normal(k, (batch, state_dim), jnp.float32)
        ref = dqn_reference(x, params, action_dim)

        # Module-faithful f32 Q-values.
        q32 = jax.block_until_ready(dqn_forward(x, params, action_dim=action_dim))
        assert q32.shape == (batch, action_dim)
        assert jnp.allclose(q32, ref, atol=1e-4, rtol=1e-4), (
            f"f32 mismatch at batch={batch}: max abs err {jnp.max(jnp.abs(q32 - ref))}")

        # bf16 padded output (reduced HBM writeback; slice in the consumer).
        qp = jax.block_until_ready(dqn_qvalues_padded(x, params))
        assert qp.dtype == jnp.bfloat16 and qp.shape[1] == LANE
        qp32 = qp[:batch, :action_dim].astype(jnp.float32)
        assert jnp.allclose(qp32, ref, atol=2e-2, rtol=2e-2), (
            f"bf16 mismatch at batch={batch}: max abs err {jnp.max(jnp.abs(qp32 - ref))}")

        # Fused in-kernel argmax (acting path).
        acts = jax.block_until_ready(
            dqn_greedy_action(x, params, action_dim=action_dim))
        assert acts.shape == (batch,)
        q_sel = jnp.take_along_axis(q32, acts[:, None], axis=1)[:, 0]
        assert bool(jnp.all(q_sel >= jnp.max(q32, axis=1) - 1e-5)), (
            f"greedy-action mismatch at batch={batch}")

    print("KERNEL_OK")
</pallas_src>

<mosaic_0001>
module attributes {stable_mosaic.version = 11 : i64} {
  func.func @dqn_qvalues_kernel(%arg0: i32, %arg1: memref<8x4xf32, #tpu.memory_space<vmem>>, %arg2: memref<4x128xf32, #tpu.memory_space<vmem>>, %arg3: memref<1x128xf32, #tpu.memory_space<vmem>>, %arg4: memref<128x128xbf16, #tpu.memory_space<vmem>>, %arg5: memref<1x128xf32, #tpu.memory_space<vmem>>, %arg6: memref<128x128xbf16, #tpu.memory_space<vmem>>, %arg7: memref<1x128xf32, #tpu.memory_space<vmem>>, %arg8: memref<8x128xf32, #tpu.memory_space<vmem>>) attributes {dimension_semantics = [#tpu.dimension_semantics<parallel>], iteration_bounds = array<i64: 1>, scalar_prefetch = 0 : i64, scratch_operands = 0 : i64, tpu.core_type = #tpu.core_type<tc>, window_params = [{transform_indices = @transform_0, window_bounds = array<i64: 8, 4>}, {pipeline_mode = #tpu.pipeline_mode<synchronous>, transform_indices = @transform_1, window_bounds = array<i64: 4, 128>}, {pipeline_mode = #tpu.pipeline_mode<synchronous>, transform_indices = @transform_2, window_bounds = array<i64: 1, 128>}, {pipeline_mode = #tpu.pipeline_mode<synchronous>, transform_indices = @transform_3, window_bounds = array<i64: 128, 128>}, {pipeline_mode = #tpu.pipeline_mode<synchronous>, transform_indices = @transform_4, window_bounds = array<i64: 1, 128>}, {pipeline_mode = #tpu.pipeline_mode<synchronous>, transform_indices = @transform_5, window_bounds = array<i64: 128, 128>}, {pipeline_mode = #tpu.pipeline_mode<synchronous>, transform_indices = @transform_6, window_bounds = array<i64: 1, 128>}, {transform_indices = @transform_7, window_bounds = array<i64: 8, 128>}]} {
    %c0 = arith.constant 0 : index
    %c0_0 = arith.constant 0 : index
    %0 = vector.load %arg1[%c0, %c0_0] : memref<8x4xf32, #tpu.memory_space<vmem>>, vector<8x4xf32>
    %c0_1 = arith.constant 0 : index
    %c0_2 = arith.constant 0 : index
    %1 = vector.load %arg3[%c0_1, %c0_2] : memref<1x128xf32, #tpu.memory_space<vmem>>, vector<1x128xf32>
    %2 = vector.extract_strided_slice %0 {offsets = [0, 0], sizes = [8, 1], strides = [1, 1]} : vector<8x4xf32> to vector<8x1xf32>
    %c0_3 = arith.constant 0 : index
    %c0_4 = arith.constant 0 : index
    %3 = vector.load %arg2[%c0_3, %c0_4] : memref<4x128xf32, #tpu.memory_space<vmem>>, vector<1x128xf32>
    %4 = vector.broadcast %2 : vector<8x1xf32> to vector<8x128xf32>
    %5 = vector.broadcast %3 : vector<1x128xf32> to vector<8x128xf32>
    %6 = arith.mulf %4, %5 : vector<8x128xf32>
    %7 = vector.broadcast %1 : vector<1x128xf32> to vector<8x128xf32>
    %8 = arith.addf %7, %6 : vector<8x128xf32>
    %9 = vector.extract_strided_slice %0 {offsets = [0, 1], sizes = [8, 1], strides = [1, 1]} : vector<8x4xf32> to vector<8x1xf32>
    %c1 = arith.constant 1 : index
    %c0_5 = arith.constant 0 : index
    %10 = vector.load %arg2[%c1, %c0_5] : memref<4x128xf32, #tpu.memory_space<vmem>>, vector<1x128xf32>
    %11 = vector.broadcast %9 : vector<8x1xf32> to vector<8x128xf32>
    %12 = vector.broadcast %10 : vector<1x128xf32> to vector<8x128xf32>
    %13 = arith.mulf %11, %12 : vector<8x128xf32>
    %14 = arith.addf %8, %13 : vector<8x128xf32>
    %15 = vector.extract_strided_slice %0 {offsets = [0, 2], sizes = [8, 1], strides = [1, 1]} : vector<8x4xf32> to vector<8x1xf32>
    %c2 = arith.constant 2 : index
    %c0_6 = arith.constant 0 : index
    %16 = vector.load %arg2[%c2, %c0_6] : memref<4x128xf32, #tpu.memory_space<vmem>>, vector<1x128xf32>
    %17 = vector.broadcast %15 : vector<8x1xf32> to vector<8x128xf32>
    %18 = vector.broadcast %16 : vector<1x128xf32> to vector<8x128xf32>
    %19 = arith.mulf %17, %18 : vector<8x128xf32>
    %20 = arith.addf %14, %19 : vector<8x128xf32>
    %21 = vector.extract_strided_slice %0 {offsets = [0, 3], sizes = [8, 1], strides = [1, 1]} : vector<8x4xf32> to vector<8x1xf32>
    %c3 = arith.constant 3 : index
    %c0_7 = arith.constant 0 : index
    %22 = vector.load %arg2[%c3, %c0_7] : memref<4x128xf32, #tpu.memory_space<vmem>>, vector<1x128xf32>
    %23 = vector.broadcast %21 : vector<8x1xf32> to vector<8x128xf32>
    %24 = vector.broadcast %22 : vector<1x128xf32> to vector<8x128xf32>
    %25 = arith.mulf %23, %24 : vector<8x128xf32>
    %26 = arith.addf %20, %25 : vector<8x128xf32>
    %cst = arith.constant 0.000000e+00 : f32
    %27 = vector.broadcast %cst : f32 to vector<8x128xf32>
    %28 = arith.maximumf %26, %27 : vector<8x128xf32>
    %29 = arith.truncf %28 : vector<8x128xf32> to vector<8x128xbf16>
    %c0_8 = arith.constant 0 : index
    %c0_9 = arith.constant 0 : index
    %30 = vector.load %arg4[%c0_8, %c0_9] : memref<128x128xbf16, #tpu.memory_space<vmem>>, vector<128x128xbf16>
    %cst_10 = arith.constant dense<0.000000e+00> : vector<8x128xf32>
    %31 = tpu.matmul %29, %30, %cst_10 {dimension_numbers = #tpu.dot_dimension_numbers<[1], [0], [0], [1], [0, 0, 1, 1], [], []>} : vector<8x128xbf16>, vector<128x128xbf16>, vector<8x128xf32> -> vector<8x128xf32>
    %c0_11 = arith.constant 0 : index
    %c0_12 = arith.constant 0 : index
    %32 = vector.load %arg5[%c0_11, %c0_12] : memref<1x128xf32, #tpu.memory_space<vmem>>, vector<1x128xf32>
    %33 = vector.broadcast %32 : vector<1x128xf32> to vector<8x128xf32>
    %34 = arith.addf %31, %33 : vector<8x128xf32>
    %cst_13 = arith.constant 0.000000e+00 : f32
    %35 = vector.broadcast %cst_13 : f32 to vector<8x128xf32>
    %36 = arith.maximumf %34, %35 : vector<8x128xf32>
    %37 = arith.truncf %36 : vector<8x128xf32> to vector<8x128xbf16>
    %c0_14 = arith.constant 0 : index
    %c0_15 = arith.constant 0 : index
    %38 = vector.load %arg6[%c0_14, %c0_15] : memref<128x128xbf16, #tpu.memory_space<vmem>>, vector<128x128xbf16>
    %cst_16 = arith.constant dense<0.000000e+00> : vector<8x128xf32>
    %39 = tpu.matmul %37, %38, %cst_16 {dimension_numbers = #tpu.dot_dimension_numbers<[1], [0], [0], [1], [0, 0, 1, 1], [], []>} : vector<8x128xbf16>, vector<128x128xbf16>, vector<8x128xf32> -> vector<8x128xf32>
    %c0_17 = arith.constant 0 : index
    %c0_18 = arith.constant 0 : index
    %40 = vector.load %arg7[%c0_17, %c0_18] : memref<1x128xf32, #tpu.memory_space<vmem>>, vector<1x128xf32>
    %41 = vector.broadcast %40 : vector<1x128xf32> to vector<8x128xf32>
    %42 = arith.addf %39, %41 : vector<8x128xf32>
    %c0_19 = arith.constant 0 : index
    %c0_20 = arith.constant 0 : index
    %43 = vector.load %arg8[%c0_19, %c0_20] : memref<8x128xf32, #tpu.memory_space<vmem>>, vector<8x128xf32>
    tpu.vector_store %arg8[%c0_19, %c0_20], %42 {strides = array<i32>} : memref<8x128xf32, #tpu.memory_space<vmem>>, vector<8x128xf32>,
    return
  }
  func.func @transform_0(%arg0: i32) -> (i32, i32) {
    %c0_i32 = arith.constant 0 : i32
    %c0_i32_0 = arith.constant 0 : i32
    return %arg0, %c0_i32 : i32, i32
  }
  func.func @transform_1(%arg0: i32) -> (i32, i32) {
    %c0_i32 = arith.constant 0 : i32
    %c0_i32_0 = arith.constant 0 : i32
    %c0_i32_1 = arith.constant 0 : i32
    return %c0_i32, %c0_i32_0 : i32, i32
  }
  func.func @transform_2(%arg0: i32) -> (i32, i32) {
    %c0_i32 = arith.constant 0 : i32
    %c0_i32_0 = arith.constant 0 : i32
    %c0_i32_1 = arith.constant 0 : i32
    return %c0_i32, %c0_i32_0 : i32, i32
  }
  func.func @transform_3(%arg0: i32) -> (i32, i32) {
    %c0_i32 = arith.constant 0 : i32
    %c0_i32_0 = arith.constant 0 : i32
    %c0_i32_1 = arith.constant 0 : i32
    return %c0_i32, %c0_i32_0 : i32, i32
  }
  func.func @transform_4(%arg0: i32) -> (i32, i32) {
    %c0_i32 = arith.constant 0 : i32
    %c0_i32_0 = arith.constant 0 : i32
    %c0_i32_1 = arith.constant 0 : i32
    return %c0_i32, %c0_i32_0 : i32, i32
  }
  func.func @transform_5(%arg0: i32) -> (i32, i32) {
    %c0_i32 = arith.constant 0 : i32
    %c0_i32_0 = arith.constant 0 : i32
    %c0_i32_1 = arith.constant 0 : i32
    return %c0_i32, %c0_i32_0 : i32, i32
  }
  func.func @transform_6(%arg0: i32) -> (i32, i32) {
    %c0_i32 = arith.constant 0 : i32
    %c0_i32_0 = arith.constant 0 : i32
    %c0_i32_1 = arith.constant 0 : i32
    return %c0_i32, %c0_i32_0 : i32, i32
  }
  func.func @transform_7(%arg0: i32) -> (i32, i32) {
    %c0_i32 = arith.constant 0 : i32
    %c0_i32_0 = arith.constant 0 : i32
    return %arg0, %c0_i32 : i32, i32
  }
}

</mosaic_0001>

<bundles_post_ra>
// kernel: dqn_forward.1
= control target key start
LH: loop header
LB: loop body
LE: loop exit
PB: predicated region body
PF: predicated region fallthrough
CT: control target
= control target key end

     0   :  { %12 = vsyncpa [#allocation3], 0  ;;  %s502_s0 = inlined_call_operand.vmem [shape: f32[8,4], index: 0, kind: input, shape index: {}]   ;;  %s503_s1 = inlined_call_operand.vmem [shape: f32[4,128], index: 1, kind: input, shape index: {}]   ;;  %s504_s2 = inlined_call_operand.vmem [shape: f32[1,128], index: 2, kind: input, shape index: {}]   ;;  %s505_s3 = inlined_call_operand.hbm [shape: bf16[128,128], index: 3, kind: input, shape index: {}]   ;;  %s506_s4 = inlined_call_operand.vmem [shape: f32[1,128], index: 4, kind: input, shape index: {}]   ;;  %s507_s5 = inlined_call_operand.hbm [shape: bf16[128,128], index: 5, kind: input, shape index: {}]   ;;  %s508_s6 = inlined_call_operand.vmem [shape: f32[1,128], index: 6, kind: input, shape index: {}]   ;;  %s509_s7 = inlined_call_operand.vmem [shape: f32[8,128], index: 7, kind: output, shape index: {}]  }
   0x1   :  { %s24_s26 = sshll.u32 %s505_s3, 4  ;;  %s25_s26 = int_to_ptr.hbm [resolvable:$true] %s24_s26 }
   0x2   :  { %13 = vsyncpa [#allocation5], 0  ;;  %s421_s27 = smov [#allocation2]   ;;  %s39_s8 = sshll.u32 %s507_s5, 4  ;;  %s40_s8 = int_to_ptr.hbm [resolvable:$true] %s39_s8 }
   0x3   :  { %s26_s28 = sshll.u32 %s421_s27, 4  ;;  %s422_s9 = smov 64   ;;  %s27_s28 = int_to_ptr.vmem [resolvable:$true] %s26_s28 }
   0x4   :  { %s423_s10 = smov 4   ;;  %s424_s11 = smov [#allocation4]  }
   0x5   :  { %32 = dma.hbm_to_vmem [thread:$0]  %s25_s26, 1024, %s27_s28, [#allocation3], %s422_s9, %s422_s9, %s423_s10  }
   0x6   :  { %s41_s12 = sshll.u32 %s424_s11, 4  ;;  %s42_s12 = int_to_ptr.vmem [resolvable:$true] %s41_s12 }
   0x7   :  { %47 = dma.hbm_to_vmem [thread:$0]  %s40_s8, 1024, %s42_s12, [#allocation5], %s422_s9, %s422_s9, %s423_s10  }
   0x8   :  { %417 = dma.done.wait [#allocation3], 1024  }
   0x9   :  { %418 = vsyncadd [#allocation3], 4294966272 }
   0xa   :  { %419 = dma.done.wait [#allocation5], 1024  }
   0xb   :  { %420 = vsyncadd [#allocation5], 4294966272  ;;  %v425_v0 = vmov 0   ;;  %v426_v1 = vmov 2   ;;  %v58_v2 = vld [vmem:[%s502_s0] sm:$0xff]  ;;  %v340_v3 = vld [vmem:[#allocation2 + $0x38] sm:$0xff] }
   0xc   :  { %357 = vset.pattern.permute.xlu0 %v425_v0  ;;  %359 = vset.pattern.permute.xlu1 %v426_v1  ;;  %v339_v4 = vld [vmem:[#allocation2 + $0x30] sm:$0xff]  ;;  %v338_v5 = vld [vmem:[#allocation2 + $0x28] sm:$0xff]  ;;  %v427_v6 = vmov 1   ;;  %v428_v7 = vmov 3   ;;  %v337_v8 = vld [vmem:[#allocation2 + $0x20] sm:$0xff] }
   0xd   :  { %63 = vperm.xlu0 %357, %v58_v2   ;;  %82 = vperm.xlu1 %359, %v58_v2   ;;  %v336_v9 = vld [vmem:[#allocation2 + $0x18] sm:$0xff]  ;;  %v335_v10 = vld [vmem:[#allocation2 + $0x10] sm:$0xff]  ;;  %v334_v11 = vld [vmem:[#allocation2 + $0x8] sm:$0xff] }
   0xe   :  { %166 = vmatpush.bf16.msra.mxu0 %v340_v3  ;;  %v333_v12 = vld [vmem:[#allocation2] sm:$0xff]  ;;  %v348_v13 = vld [vmem:[#allocation4 + $0x38] sm:$0xff]  ;;  %v347_v14 = vld [vmem:[#allocation4 + $0x30] sm:$0xff] }
   0xf   :  { %249 = vmatpush.bf16.msra.mxu1 %v348_v13  ;;  %v346_v15 = vld [vmem:[#allocation4 + $0x28] sm:$0xff]  ;;  %v345_v18 = vld [vmem:[#allocation4 + $0x20] sm:$0xff]  ;;  %v344_v20 = vld [vmem:[#allocation4 + $0x18] sm:$0xff] }
  0x10   :  { %v362_v19 = vld [vmem:[%s503_s1] ss:$0 sm:$0xff]  ;;  %v365_v23 = vld [vmem:[%s503_s1 + $0x1] ss:$0 sm:$0xff]  ;;  %v364_v24 = vld [vmem:[%s503_s1 + $0x2] ss:$0 sm:$0xff] }
  0x11   :  { %v363_v21 = vld [vmem:[%s504_s2] ss:$0 sm:$0xff]  ;;  %v366_v25 = vld [vmem:[%s503_s1 + $0x3] ss:$0 sm:$0xff]  ;;  %v343_v26 = vld [vmem:[#allocation4 + $0x10] sm:$0xff] }
  0x12   :  { %167 = vmatpush.bf16.msra.mxu0 %v339_v4  ;;  %v342_v38 = vld [vmem:[#allocation4 + $0x8] sm:$0xff]  ;;  %v341_v39 = vld [vmem:[#allocation4] sm:$0xff] }
  0x13   :  { %250 = vmatpush.bf16.msra.mxu1 %v347_v14  ;;  %v367_v40 = vld [vmem:[%s506_s4] ss:$0 sm:$0xff] }
  0x14   :  { %v368_v46 = vld [vmem:[%s508_s6] ss:$0 sm:$0xff] }
  0x15   :  { %358 = vset.pattern.permute.xlu0 %v427_v6  ;;  %360 = vset.pattern.permute.xlu1 %v428_v7 }
  0x16   :  { %74 = vperm.xlu0 %358, %v58_v2   ;;  %90 = vperm.xlu1 %360, %v58_v2  }
  0x17   :  { %168 = vmatpush.bf16.msra.mxu0 %v338_v5  ;;  %251 = vmatpush.bf16.msra.mxu1 %v346_v15 }
  0x1b   :  { %169 = vmatpush.bf16.msra.mxu0 %v337_v8  ;;  %252 = vmatpush.bf16.msra.mxu1 %v345_v18 }
  0x1e   :  { %361 = vset.pattern.permute.xlu0 %v428_v7 }
  0x1f   :  { %170 = vmatpush.bf16.msra.mxu0 %v336_v9  ;;  %253 = vmatpush.bf16.msra.mxu1 %v344_v20 }
  0x23   :  { %171 = vmatpush.bf16.msra.mxu0 %v335_v10  ;;  %254 = vmatpush.bf16.msra.mxu1 %v343_v26 }
  0x27   :  { %172 = vmatpush.bf16.msra.mxu0 %v334_v11  ;;  %255 = vmatpush.bf16.msra.mxu1 %v342_v38 }
  0x2b   :  { %173 = vmatpush.bf16.msra.mxu0 %v333_v12  ;;  %256 = vmatpush.bf16.msra.mxu1 %v341_v39 }
  0x7f   :  { %v64_v16 = vpop.permute.xlu0 %63  ;;  %v83_v17 = vpop.permute.xlu1 %82 }
  0x80   :  { %v67_v22 = vmul.f32 %v362_v19, %v64_v16  ;;  %v86_v31 = vmul.f32 %v364_v24, %v83_v17 }
  0x82   :  { %v71_v29 = vadd.f32 %v363_v21, %v67_v22 }
  0x88   :  { %v75_v27 = vpop.permute.xlu0 %74  ;;  %v91_v28 = vpop.permute.xlu1 %90 }
  0x89   :  { %v78_v30 = vmul.f32 %v365_v23, %v75_v27  ;;  %v94_v33 = vmul.f32 %v366_v25, %v91_v28 }
  0x8b   :  { %v79_v32 = vadd.f32 %v78_v30, %v71_v29 }
  0x8d   :  { %v87_v34 = vadd.f32 %v86_v31, %v79_v32 }
  0x8f   :  { %v95_v35 = vadd.f32 %v94_v33, %v87_v34 }
  0x91   :  { %v96_v36 = vmax.f32 %v95_v35, 0.0 }
  0x93   :  { %v97_v37 = vpack.c.bf16 %v96_v36, %v96_v36 }
  0x95   :  { %174 = vmatmul.bf16.vlgmr.msra.gmra.mxu0 %v97_v37 }
 0x112   :  { %v175_v41 = vpop.f32.mrf.mxu0 }
 0x113   :  { %v176_v42 = vadd.f32 %v367_v40, %v175_v41 }
 0x115   :  { %v179_v43 = vmax.f32 %v176_v42, 0.0 }
 0x117   :  { %v180_v44 = vpack.c.bf16 %v179_v43, %v179_v43 }
 0x119   :  { %257 = vmatmul.bf16.vlgmr.msra.gmra.mxu1 %v180_v44 }
 0x11a   :  { %v177_v45 = vpop.f32.mrf.mxu0 }
 0x196   :  { %v258_v47 = vpop.f32.mrf.mxu1 }
 0x197   :  { %v259_v48 = vadd.f32 %v368_v46, %v258_v47 }
 0x199   :  { %262 = vst [vmem:[%s509_s7] sm:$0xff] %v259_v48 }
 0x19e   :  { %v260_v49 = vpop.f32.mrf.mxu1 }
 0x19f   :  { %267 = vsyncpa [#allocation3], 1 }
 0x1a0   :  { %268 = vsyncpa [#allocation5], 1 }

</bundles_post_ra>
